<compile_context>
chip_gen: v7x
topology: tpu7x:2x2x1
jax: 0.10.0
libtpu: 0.0.40
codegen_flags: <defaults>
</compile_context>

<pallas_src>
import jax
import jax.numpy as jnp
import numpy as np
from jax.experimental import pallas as pl
from jax.experimental.pallas import tpu as pltpu


# ----------------------------- fused Pallas kernel -------------------------- #

def _make_fused_kernel(n_layers, T, N, H, F):
    """Fused forward.  Ref order:
       x, [wih_t, whh_t, b] * n_layers, w1_t, b1, w2_t, b2, wout3d, bout, out.
    Gate order follows PyTorch: i, f, g, o.  All math in f32.
    """

    def kernel(*refs):
        x_ref = refs[0]
        pos = 1
        lstm = []
        for _ in range(n_layers):
            lstm.append((refs[pos], refs[pos + 1], refs[pos + 2]))
            pos += 3
        w1_ref, b1_ref, w2_ref, b2_ref, wout_ref, bout_ref = refs[pos:pos + 6]
        o_ref = refs[pos + 6]

        # (T, N, F) -> (T*N, F); rows are t-major, n-minor (sublane-aligned, N=8).
        h2d = x_ref[...].reshape(T * N, F)

        # ---- stacked LSTM, statically unrolled over layers and time ---------
        for (wih_ref, whh_ref, b_ref) in lstm:
            whh = whh_ref[...]                                        # (H, 4H)
            # Hoisted out of the recurrence: input projection + bias for all t.
            xg = (jnp.dot(h2d, wih_ref[...],
                          preferred_element_type=jnp.float32)
                  + b_ref[...])                                       # (T*N, 4H)
            h_t = None
            c_t = None
            outs = []
            for t in range(T):                                        # full unroll
                g = xg[t * N:(t + 1) * N, :]                          # (N, 4H)
                if t > 0:
                    g = g + jnp.dot(h_t, whh,
                                    preferred_element_type=jnp.float32)
                i_g = jax.nn.sigmoid(g[:, 0 * H:1 * H])
                g_g = jnp.tanh(g[:, 2 * H:3 * H])
                o_g = jax.nn.sigmoid(g[:, 3 * H:4 * H])
                if t == 0:                                            # c_0 == 0
                    c_t = i_g * g_g
                else:
                    f_g = jax.nn.sigmoid(g[:, 1 * H:2 * H])
                    c_t = f_g * c_t + i_g * g_g
                h_t = o_g * jnp.tanh(c_t)
                outs.append(h_t)
            h2d = jnp.concatenate(outs, axis=0)                       # (T*N, H)

        # ---- MLP head: Linear -> LeakyReLU(0.1) -> Linear -> Tanh -----------
        h1 = (jnp.dot(h2d, w1_ref[...], preferred_element_type=jnp.float32)
              + b1_ref[...])
        h1 = jnp.where(h1 > 0, h1, 0.1 * h1)
        h2 = jnp.tanh(jnp.dot(h1, w2_ref[...],
                              preferred_element_type=jnp.float32)
                      + b2_ref[...])                                  # (T*N, F)

        # ---- Flatten(start_dim=1) + Linear(N*F, 1) + Sigmoid -----------------
        # wout3d is the PyTorch (1, N*F) weight reshaped row-major to (1, N, F),
        # so this contraction matches PyTorch's flatten order exactly.
        prod = h2.reshape(T, N, F) * wout_ref[...]                    # (T, N, F)
        s = jnp.sum(prod, axis=2)                                     # (T, N)
        ones_1n = jnp.ones((1, N), jnp.float32)
        logits = jax.lax.dot_general(                                 # (1, T) lane-dense
            ones_1n, s, (((1,), (1,)), ((), ())),
            preferred_element_type=jnp.float32)
        o_ref[...] = jax.nn.sigmoid(logits + bout_ref[0, 0])

    return kernel


# ----------------------------- wrapper -------------------------------------- #

@jax.jit
def discriminator_forward(x, params):
    T, N, F = x.shape
    H = params["lstm"][0][1].shape[0]
    n_layers = len(params["lstm"])

    inputs = [x]
    for trip in params["lstm"]:
        inputs.extend(trip)
    inputs += [params["w1_t"], params["b1"], params["w2_t"], params["b2"],
               params["wout3d"], params["bout"]]

    vmem = pl.BlockSpec(memory_space=pltpu.MemorySpace.VMEM)
    out = pl.pallas_call(
        _make_fused_kernel(n_layers, T, N, H, F),
        out_shape=jax.ShapeDtypeStruct((1, T), jnp.float32),
        in_specs=[vmem] * len(inputs),
        out_specs=vmem,
    )(*inputs)
    return out[0]                       # (B,) -- matches PyTorch .squeeze()


# ----------------------------- parameter init ------------------------------- #

def init_params(key, seq_len, n_feat, hidden_dim, n_layers):
    # PyTorch-style uniform(-1/sqrt(fan), 1/sqrt(fan)) init; shapes match nn.Module.
    # Weights stored pre-transposed for x @ W.T layouts.  dropout=0 (module default).
    params = {"lstm": []}
    H = hidden_dim
    k_lstm = 1.0 / np.sqrt(H)
    keys = iter(jax.random.split(key, 4 * n_layers + 6))

    for layer in range(n_layers):
        fin = n_feat if layer == 0 else H
        wih = jax.random.uniform(next(keys), (4 * H, fin), jnp.float32, -k_lstm, k_lstm)
        whh = jax.random.uniform(next(keys), (4 * H, H), jnp.float32, -k_lstm, k_lstm)
        bih = jax.random.uniform(next(keys), (4 * H,), jnp.float32, -k_lstm, k_lstm)
        bhh = jax.random.uniform(next(keys), (4 * H,), jnp.float32, -k_lstm, k_lstm)
        params["lstm"].append((wih.T, whh.T, (bih + bhh).reshape(1, 4 * H)))

    k1 = 1.0 / np.sqrt(H)
    w1 = jax.random.uniform(next(keys), (2 * H, H), jnp.float32, -k1, k1)
    b1 = jax.random.uniform(next(keys), (2 * H,), jnp.float32, -k1, k1)
    k2 = 1.0 / np.sqrt(2 * H)
    w2 = jax.random.uniform(next(keys), (n_feat, 2 * H), jnp.float32, -k2, k2)
    b2 = jax.random.uniform(next(keys), (n_feat,), jnp.float32, -k2, k2)
    ko = 1.0 / np.sqrt(seq_len * n_feat)
    wout = jax.random.uniform(next(keys), (1, seq_len * n_feat), jnp.float32, -ko, ko)
    bout = jax.random.uniform(next(keys), (1,), jnp.float32, -ko, ko)

    params["w1_t"] = w1.T
    params["b1"] = b1.reshape(1, 2 * H)
    params["w2_t"] = w2.T
    params["b2"] = b2.reshape(1, n_feat)
    params["wout3d"] = wout.reshape(1, seq_len, n_feat)   # row-major == flatten order
    params["bout"] = bout.reshape(1, 1)
    return params


# ----------------------------- pure-JAX reference --------------------------- #

def reference_forward(x, params):
    h = x
    for (wih_t, whh_t, b) in params["lstm"]:
        T, N, _ = h.shape
        H = whh_t.shape[0]

        def step(carry, x_t, wih_t=wih_t, whh_t=whh_t, b=b, H=H):
            hp, cp = carry
            gates = x_t @ wih_t + hp @ whh_t + b
            i = jax.nn.sigmoid(gates[:, :H])
            f = jax.nn.sigmoid(gates[:, H:2 * H])
            g = jnp.tanh(gates[:, 2 * H:3 * H])
            o = jax.nn.sigmoid(gates[:, 3 * H:])
            c = f * cp + i * g
            hn = o * jnp.tanh(c)
            return (hn, c), hn

        init = (jnp.zeros((N, H), jnp.float32), jnp.zeros((N, H), jnp.float32))
        _, h = jax.lax.scan(step, init, h)
    T, N, H = h.shape
    h1 = h.reshape(T * N, H) @ params["w1_t"] + params["b1"]
    h1 = jnp.where(h1 > 0, h1, 0.1 * h1)
    h2 = jnp.tanh(h1 @ params["w2_t"] + params["b2"])
    flat = h2.reshape(T, -1)
    logits = flat @ params["wout3d"].reshape(-1, 1) + params["bout"][0, 0]
    return jnp.squeeze(jax.nn.sigmoid(logits))


# ----------------------------- main ------------------------------------------ #

if __name__ == "__main__":
    B, SEQ_LEN, N_FEAT, HIDDEN, N_LAYERS = 2, 8, 4, 32, 4

    key = jax.random.PRNGKey(0)
    kx, kp = jax.random.split(key)
    x = jax.random.normal(kx, (B, SEQ_LEN, N_FEAT), jnp.float32)
    params = init_params(kp, SEQ_LEN, N_FEAT, HIDDEN, N_LAYERS)

    out = jax.block_until_ready(discriminator_forward(x, params))
    ref = jax.block_until_ready(reference_forward(x, params))

    assert out.shape == (B,), out.shape
    np.testing.assert_allclose(np.asarray(out), np.asarray(ref), rtol=3e-2, atol=3e-2)

    print("KERNEL_OK")
</pallas_src>

<mosaic_0001>
module attributes {stable_mosaic.version = 11 : i64} {
  func.func @kernel(%arg0: memref<2x8x4xf32, #tpu.memory_space<vmem>>, %arg1: memref<4x128xf32, #tpu.memory_space<vmem>>, %arg2: memref<32x128xf32, #tpu.memory_space<vmem>>, %arg3: memref<1x128xf32, #tpu.memory_space<vmem>>, %arg4: memref<32x128xf32, #tpu.memory_space<vmem>>, %arg5: memref<32x128xf32, #tpu.memory_space<vmem>>, %arg6: memref<1x128xf32, #tpu.memory_space<vmem>>, %arg7: memref<32x128xf32, #tpu.memory_space<vmem>>, %arg8: memref<32x128xf32, #tpu.memory_space<vmem>>, %arg9: memref<1x128xf32, #tpu.memory_space<vmem>>, %arg10: memref<32x128xf32, #tpu.memory_space<vmem>>, %arg11: memref<32x128xf32, #tpu.memory_space<vmem>>, %arg12: memref<1x128xf32, #tpu.memory_space<vmem>>, %arg13: memref<32x64xf32, #tpu.memory_space<vmem>>, %arg14: memref<1x64xf32, #tpu.memory_space<vmem>>, %arg15: memref<64x4xf32, #tpu.memory_space<vmem>>, %arg16: memref<1x4xf32, #tpu.memory_space<vmem>>, %arg17: memref<1x8x4xf32, #tpu.memory_space<vmem>>, %arg18: memref<1x1xf32, #tpu.memory_space<vmem>>, %arg19: memref<1x2xf32, #tpu.memory_space<vmem>>) attributes {dimension_semantics = [], scalar_prefetch = 0 : i64, scratch_operands = 0 : i64, tpu.core_type = #tpu.core_type<tc>} {
    %c0 = arith.constant 0 : index
    %c0_0 = arith.constant 0 : index
    %c0_1 = arith.constant 0 : index
    %0 = vector.load %arg0[%c0, %c0_0, %c0_1] : memref<2x8x4xf32, #tpu.memory_space<vmem>>, vector<2x8x4xf32>
    %1 = vector.shape_cast %0 : vector<2x8x4xf32> to vector<16x4xf32>
    %c0_2 = arith.constant 0 : index
    %c0_3 = arith.constant 0 : index
    %2 = vector.load %arg2[%c0_2, %c0_3] : memref<32x128xf32, #tpu.memory_space<vmem>>, vector<32x128xf32>
    %c0_4 = arith.constant 0 : index
    %c0_5 = arith.constant 0 : index
    %3 = vector.load %arg1[%c0_4, %c0_5] : memref<4x128xf32, #tpu.memory_space<vmem>>, vector<4x128xf32>
    %cst = arith.constant dense<0.000000e+00> : vector<16x128xf32>
    %4 = tpu.matmul %1, %3, %cst {dimension_numbers = #tpu.dot_dimension_numbers<[1], [0], [0], [1], [0, 0, 1, 1], [], []>} : vector<16x4xf32>, vector<4x128xf32>, vector<16x128xf32> -> vector<16x128xf32>
    %c0_6 = arith.constant 0 : index
    %c0_7 = arith.constant 0 : index
    %5 = vector.load %arg3[%c0_6, %c0_7] : memref<1x128xf32, #tpu.memory_space<vmem>>, vector<1x128xf32>
    %6 = vector.broadcast %5 : vector<1x128xf32> to vector<16x128xf32>
    %7 = arith.addf %4, %6 : vector<16x128xf32>
    %8 = vector.extract_strided_slice %7 {offsets = [0, 0], sizes = [8, 128], strides = [1, 1]} : vector<16x128xf32> to vector<8x128xf32>
    %9 = vector.extract_strided_slice %8 {offsets = [0, 0], sizes = [8, 32], strides = [1, 1]} : vector<8x128xf32> to vector<8x32xf32>
    %10 = arith.negf %9 : vector<8x32xf32>
    %11 = math.exp %10 : vector<8x32xf32>
    %cst_8 = arith.constant 1.000000e+00 : f32
    %12 = vector.broadcast %cst_8 : f32 to vector<8x32xf32>
    %13 = arith.addf %12, %11 : vector<8x32xf32>
    %14 = arith.divf %12, %13 : vector<8x32xf32>
    %15 = vector.extract_strided_slice %8 {offsets = [0, 64], sizes = [8, 32], strides = [1, 1]} : vector<8x128xf32> to vector<8x32xf32>
    %16 = math.tanh %15 : vector<8x32xf32>
    %17 = vector.extract_strided_slice %8 {offsets = [0, 96], sizes = [8, 32], strides = [1, 1]} : vector<8x128xf32> to vector<8x32xf32>
    %18 = arith.negf %17 : vector<8x32xf32>
    %19 = math.exp %18 : vector<8x32xf32>
    %cst_9 = arith.constant 1.000000e+00 : f32
    %20 = vector.broadcast %cst_9 : f32 to vector<8x32xf32>
    %21 = arith.addf %20, %19 : vector<8x32xf32>
    %22 = arith.divf %20, %21 : vector<8x32xf32>
    %23 = arith.mulf %14, %16 : vector<8x32xf32>
    %24 = math.tanh %23 : vector<8x32xf32>
    %25 = arith.mulf %22, %24 : vector<8x32xf32>
    %26 = vector.extract_strided_slice %7 {offsets = [8, 0], sizes = [8, 128], strides = [1, 1]} : vector<16x128xf32> to vector<8x128xf32>
    %cst_10 = arith.constant dense<0.000000e+00> : vector<8x128xf32>
    %27 = tpu.matmul %25, %2, %cst_10 {dimension_numbers = #tpu.dot_dimension_numbers<[1], [0], [0], [1], [0, 0, 1, 1], [], []>} : vector<8x32xf32>, vector<32x128xf32>, vector<8x128xf32> -> vector<8x128xf32>
    %28 = arith.addf %26, %27 : vector<8x128xf32>
    %29 = vector.extract_strided_slice %28 {offsets = [0, 0], sizes = [8, 32], strides = [1, 1]} : vector<8x128xf32> to vector<8x32xf32>
    %30 = arith.negf %29 : vector<8x32xf32>
    %31 = math.exp %30 : vector<8x32xf32>
    %cst_11 = arith.constant 1.000000e+00 : f32
    %32 = vector.broadcast %cst_11 : f32 to vector<8x32xf32>
    %33 = arith.addf %32, %31 : vector<8x32xf32>
    %34 = arith.divf %32, %33 : vector<8x32xf32>
    %35 = vector.extract_strided_slice %28 {offsets = [0, 64], sizes = [8, 32], strides = [1, 1]} : vector<8x128xf32> to vector<8x32xf32>
    %36 = math.tanh %35 : vector<8x32xf32>
    %37 = vector.extract_strided_slice %28 {offsets = [0, 96], sizes = [8, 32], strides = [1, 1]} : vector<8x128xf32> to vector<8x32xf32>
    %38 = arith.negf %37 : vector<8x32xf32>
    %39 = math.exp %38 : vector<8x32xf32>
    %cst_12 = arith.constant 1.000000e+00 : f32
    %40 = vector.broadcast %cst_12 : f32 to vector<8x32xf32>
    %41 = arith.addf %40, %39 : vector<8x32xf32>
    %42 = arith.divf %40, %41 : vector<8x32xf32>
    %43 = vector.extract_strided_slice %28 {offsets = [0, 32], sizes = [8, 32], strides = [1, 1]} : vector<8x128xf32> to vector<8x32xf32>
    %44 = arith.negf %43 : vector<8x32xf32>
    %45 = math.exp %44 : vector<8x32xf32>
    %cst_13 = arith.constant 1.000000e+00 : f32
    %46 = vector.broadcast %cst_13 : f32 to vector<8x32xf32>
    %47 = arith.addf %46, %45 : vector<8x32xf32>
    %48 = arith.divf %46, %47 : vector<8x32xf32>
    %49 = arith.mulf %48, %23 : vector<8x32xf32>
    %50 = arith.mulf %34, %36 : vector<8x32xf32>
    %51 = arith.addf %49, %50 : vector<8x32xf32>
    %52 = math.tanh %51 : vector<8x32xf32>
    %53 = arith.mulf %42, %52 : vector<8x32xf32>
    %54 = tpu.concatenate %25, %53 in 0 : vector<8x32xf32>, vector<8x32xf32> -> vector<16x32xf32>
    %c0_14 = arith.constant 0 : index
    %c0_15 = arith.constant 0 : index
    %55 = vector.load %arg5[%c0_14, %c0_15] : memref<32x128xf32, #tpu.memory_space<vmem>>, vector<32x128xf32>
    %c0_16 = arith.constant 0 : index
    %c0_17 = arith.constant 0 : index
    %56 = vector.load %arg4[%c0_16, %c0_17] : memref<32x128xf32, #tpu.memory_space<vmem>>, vector<32x128xf32>
    %cst_18 = arith.constant dense<0.000000e+00> : vector<16x128xf32>
    %57 = tpu.matmul %54, %56, %cst_18 {dimension_numbers = #tpu.dot_dimension_numbers<[1], [0], [0], [1], [0, 0, 1, 1], [], []>} : vector<16x32xf32>, vector<32x128xf32>, vector<16x128xf32> -> vector<16x128xf32>
    %c0_19 = arith.constant 0 : index
    %c0_20 = arith.constant 0 : index
    %58 = vector.load %arg6[%c0_19, %c0_20] : memref<1x128xf32, #tpu.memory_space<vmem>>, vector<1x128xf32>
    %59 = vector.broadcast %58 : vector<1x128xf32> to vector<16x128xf32>
    %60 = arith.addf %57, %59 : vector<16x128xf32>
    %61 = vector.extract_strided_slice %60 {offsets = [0, 0], sizes = [8, 128], strides = [1, 1]} : vector<16x128xf32> to vector<8x128xf32>
    %62 = vector.extract_strided_slice %61 {offsets = [0, 0], sizes = [8, 32], strides = [1, 1]} : vector<8x128xf32> to vector<8x32xf32>
    %63 = arith.negf %62 : vector<8x32xf32>
    %64 = math.exp %63 : vector<8x32xf32>
    %cst_21 = arith.constant 1.000000e+00 : f32
    %65 = vector.broadcast %cst_21 : f32 to vector<8x32xf32>
    %66 = arith.addf %65, %64 : vector<8x32xf32>
    %67 = arith.divf %65, %66 : vector<8x32xf32>
    %68 = vector.extract_strided_slice %61 {offsets = [0, 64], sizes = [8, 32], strides = [1, 1]} : vector<8x128xf32> to vector<8x32xf32>
    %69 = math.tanh %68 : vector<8x32xf32>
    %70 = vector.extract_strided_slice %61 {offsets = [0, 96], sizes = [8, 32], strides = [1, 1]} : vector<8x128xf32> to vector<8x32xf32>
    %71 = arith.negf %70 : vector<8x32xf32>
    %72 = math.exp %71 : vector<8x32xf32>
    %cst_22 = arith.constant 1.000000e+00 : f32
    %73 = vector.broadcast %cst_22 : f32 to vector<8x32xf32>
    %74 = arith.addf %73, %72 : vector<8x32xf32>
    %75 = arith.divf %73, %74 : vector<8x32xf32>
    %76 = arith.mulf %67, %69 : vector<8x32xf32>
    %77 = math.tanh %76 : vector<8x32xf32>
    %78 = arith.mulf %75, %77 : vector<8x32xf32>
    %79 = vector.extract_strided_slice %60 {offsets = [8, 0], sizes = [8, 128], strides = [1, 1]} : vector<16x128xf32> to vector<8x128xf32>
    %cst_23 = arith.constant dense<0.000000e+00> : vector<8x128xf32>
    %80 = tpu.matmul %78, %55, %cst_23 {dimension_numbers = #tpu.dot_dimension_numbers<[1], [0], [0], [1], [0, 0, 1, 1], [], []>} : vector<8x32xf32>, vector<32x128xf32>, vector<8x128xf32> -> vector<8x128xf32>
    %81 = arith.addf %79, %80 : vector<8x128xf32>
    %82 = vector.extract_strided_slice %81 {offsets = [0, 0], sizes = [8, 32], strides = [1, 1]} : vector<8x128xf32> to vector<8x32xf32>
    %83 = arith.negf %82 : vector<8x32xf32>
    %84 = math.exp %83 : vector<8x32xf32>
    %cst_24 = arith.constant 1.000000e+00 : f32
    %85 = vector.broadcast %cst_24 : f32 to vector<8x32xf32>
    %86 = arith.addf %85, %84 : vector<8x32xf32>
    %87 = arith.divf %85, %86 : vector<8x32xf32>
    %88 = vector.extract_strided_slice %81 {offsets = [0, 64], sizes = [8, 32], strides = [1, 1]} : vector<8x128xf32> to vector<8x32xf32>
    %89 = math.tanh %88 : vector<8x32xf32>
    %90 = vector.extract_strided_slice %81 {offsets = [0, 96], sizes = [8, 32], strides = [1, 1]} : vector<8x128xf32> to vector<8x32xf32>
    %91 = arith.negf %90 : vector<8x32xf32>
    %92 = math.exp %91 : vector<8x32xf32>
    %cst_25 = arith.constant 1.000000e+00 : f32
    %93 = vector.broadcast %cst_25 : f32 to vector<8x32xf32>
    %94 = arith.addf %93, %92 : vector<8x32xf32>
    %95 = arith.divf %93, %94 : vector<8x32xf32>
    %96 = vector.extract_strided_slice %81 {offsets = [0, 32], sizes = [8, 32], strides = [1, 1]} : vector<8x128xf32> to vector<8x32xf32>
    %97 = arith.negf %96 : vector<8x32xf32>
    %98 = math.exp %97 : vector<8x32xf32>
    %cst_26 = arith.constant 1.000000e+00 : f32
    %99 = vector.broadcast %cst_26 : f32 to vector<8x32xf32>
    %100 = arith.addf %99, %98 : vector<8x32xf32>
    %101 = arith.divf %99, %100 : vector<8x32xf32>
    %102 = arith.mulf %101, %76 : vector<8x32xf32>
    %103 = arith.mulf %87, %89 : vector<8x32xf32>
    %104 = arith.addf %102, %103 : vector<8x32xf32>
    %105 = math.tanh %104 : vector<8x32xf32>
    %106 = arith.mulf %95, %105 : vector<8x32xf32>
    %107 = tpu.concatenate %78, %106 in 0 : vector<8x32xf32>, vector<8x32xf32> -> vector<16x32xf32>
    %c0_27 = arith.constant 0 : index
    %c0_28 = arith.constant 0 : index
    %108 = vector.load %arg8[%c0_27, %c0_28] : memref<32x128xf32, #tpu.memory_space<vmem>>, vector<32x128xf32>
    %c0_29 = arith.constant 0 : index
    %c0_30 = arith.constant 0 : index
    %109 = vector.load %arg7[%c0_29, %c0_30] : memref<32x128xf32, #tpu.memory_space<vmem>>, vector<32x128xf32>
    %cst_31 = arith.constant dense<0.000000e+00> : vector<16x128xf32>
    %110 = tpu.matmul %107, %109, %cst_31 {dimension_numbers = #tpu.dot_dimension_numbers<[1], [0], [0], [1], [0, 0, 1, 1], [], []>} : vector<16x32xf32>, vector<32x128xf32>, vector<16x128xf32> -> vector<16x128xf32>
    %c0_32 = arith.constant 0 : index
    %c0_33 = arith.constant 0 : index
    %111 = vector.load %arg9[%c0_32, %c0_33] : memref<1x128xf32, #tpu.memory_space<vmem>>, vector<1x128xf32>
    %112 = vector.broadcast %111 : vector<1x128xf32> to vector<16x128xf32>
    %113 = arith.addf %110, %112 : vector<16x128xf32>
    %114 = vector.extract_strided_slice %113 {offsets = [0, 0], sizes = [8, 128], strides = [1, 1]} : vector<16x128xf32> to vector<8x128xf32>
    %115 = vector.extract_strided_slice %114 {offsets = [0, 0], sizes = [8, 32], strides = [1, 1]} : vector<8x128xf32> to vector<8x32xf32>
    %116 = arith.negf %115 : vector<8x32xf32>
    %117 = math.exp %116 : vector<8x32xf32>
    %cst_34 = arith.constant 1.000000e+00 : f32
    %118 = vector.broadcast %cst_34 : f32 to vector<8x32xf32>
    %119 = arith.addf %118, %117 : vector<8x32xf32>
    %120 = arith.divf %118, %119 : vector<8x32xf32>
    %121 = vector.extract_strided_slice %114 {offsets = [0, 64], sizes = [8, 32], strides = [1, 1]} : vector<8x128xf32> to vector<8x32xf32>
    %122 = math.tanh %121 : vector<8x32xf32>
    %123 = vector.extract_strided_slice %114 {offsets = [0, 96], sizes = [8, 32], strides = [1, 1]} : vector<8x128xf32> to vector<8x32xf32>
    %124 = arith.negf %123 : vector<8x32xf32>
    %125 = math.exp %124 : vector<8x32xf32>
    %cst_35 = arith.constant 1.000000e+00 : f32
    %126 = vector.broadcast %cst_35 : f32 to vector<8x32xf32>
    %127 = arith.addf %126, %125 : vector<8x32xf32>
    %128 = arith.divf %126, %127 : vector<8x32xf32>
    %129 = arith.mulf %120, %122 : vector<8x32xf32>
    %130 = math.tanh %129 : vector<8x32xf32>
    %131 = arith.mulf %128, %130 : vector<8x32xf32>
    %132 = vector.extract_strided_slice %113 {offsets = [8, 0], sizes = [8, 128], strides = [1, 1]} : vector<16x128xf32> to vector<8x128xf32>
    %cst_36 = arith.constant dense<0.000000e+00> : vector<8x128xf32>
    %133 = tpu.matmul %131, %108, %cst_36 {dimension_numbers = #tpu.dot_dimension_numbers<[1], [0], [0], [1], [0, 0, 1, 1], [], []>} : vector<8x32xf32>, vector<32x128xf32>, vector<8x128xf32> -> vector<8x128xf32>
    %134 = arith.addf %132, %133 : vector<8x128xf32>
    %135 = vector.extract_strided_slice %134 {offsets = [0, 0], sizes = [8, 32], strides = [1, 1]} : vector<8x128xf32> to vector<8x32xf32>
    %136 = arith.negf %135 : vector<8x32xf32>
    %137 = math.exp %136 : vector<8x32xf32>
    %cst_37 = arith.constant 1.000000e+00 : f32
    %138 = vector.broadcast %cst_37 : f32 to vector<8x32xf32>
    %139 = arith.addf %138, %137 : vector<8x32xf32>
    %140 = arith.divf %138, %139 : vector<8x32xf32>
    %141 = vector.extract_strided_slice %134 {offsets = [0, 64], sizes = [8, 32], strides = [1, 1]} : vector<8x128xf32> to vector<8x32xf32>
    %142 = math.tanh %141 : vector<8x32xf32>
    %143 = vector.extract_strided_slice %134 {offsets = [0, 96], sizes = [8, 32], strides = [1, 1]} : vector<8x128xf32> to vector<8x32xf32>
    %144 = arith.negf %143 : vector<8x32xf32>
    %145 = math.exp %144 : vector<8x32xf32>
    %cst_38 = arith.constant 1.000000e+00 : f32
    %146 = vector.broadcast %cst_38 : f32 to vector<8x32xf32>
    %147 = arith.addf %146, %145 : vector<8x32xf32>
    %148 = arith.divf %146, %147 : vector<8x32xf32>
    %149 = vector.extract_strided_slice %134 {offsets = [0, 32], sizes = [8, 32], strides = [1, 1]} : vector<8x128xf32> to vector<8x32xf32>
    %150 = arith.negf %149 : vector<8x32xf32>
    %151 = math.exp %150 : vector<8x32xf32>
    %cst_39 = arith.constant 1.000000e+00 : f32
    %152 = vector.broadcast %cst_39 : f32 to vector<8x32xf32>
    %153 = arith.addf %152, %151 : vector<8x32xf32>
    %154 = arith.divf %152, %153 : vector<8x32xf32>
    %155 = arith.mulf %154, %129 : vector<8x32xf32>
    %156 = arith.mulf %140, %142 : vector<8x32xf32>
    %157 = arith.addf %155, %156 : vector<8x32xf32>
    %158 = math.tanh %157 : vector<8x32xf32>
    %159 = arith.mulf %148, %158 : vector<8x32xf32>
    %160 = tpu.concatenate %131, %159 in 0 : vector<8x32xf32>, vector<8x32xf32> -> vector<16x32xf32>
    %c0_40 = arith.constant 0 : index
    %c0_41 = arith.constant 0 : index
    %161 = vector.load %arg11[%c0_40, %c0_41] : memref<32x128xf32, #tpu.memory_space<vmem>>, vector<32x128xf32>
    %c0_42 = arith.constant 0 : index
    %c0_43 = arith.constant 0 : index
    %162 = vector.load %arg10[%c0_42, %c0_43] : memref<32x128xf32, #tpu.memory_space<vmem>>, vector<32x128xf32>
    %cst_44 = arith.constant dense<0.000000e+00> : vector<16x128xf32>
    %163 = tpu.matmul %160, %162, %cst_44 {dimension_numbers = #tpu.dot_dimension_numbers<[1], [0], [0], [1], [0, 0, 1, 1], [], []>} : vector<16x32xf32>, vector<32x128xf32>, vector<16x128xf32> -> vector<16x128xf32>
    %c0_45 = arith.constant 0 : index
    %c0_46 = arith.constant 0 : index
    %164 = vector.load %arg12[%c0_45, %c0_46] : memref<1x128xf32, #tpu.memory_space<vmem>>, vector<1x128xf32>
    %165 = vector.broadcast %164 : vector<1x128xf32> to vector<16x128xf32>
    %166 = arith.addf %163, %165 : vector<16x128xf32>
    %167 = vector.extract_strided_slice %166 {offsets = [0, 0], sizes = [8, 128], strides = [1, 1]} : vector<16x128xf32> to vector<8x128xf32>
    %168 = vector.extract_strided_slice %167 {offsets = [0, 0], sizes = [8, 32], strides = [1, 1]} : vector<8x128xf32> to vector<8x32xf32>
    %169 = arith.negf %168 : vector<8x32xf32>
    %170 = math.exp %169 : vector<8x32xf32>
    %cst_47 = arith.constant 1.000000e+00 : f32
    %171 = vector.broadcast %cst_47 : f32 to vector<8x32xf32>
    %172 = arith.addf %171, %170 : vector<8x32xf32>
    %173 = arith.divf %171, %172 : vector<8x32xf32>
    %174 = vector.extract_strided_slice %167 {offsets = [0, 64], sizes = [8, 32], strides = [1, 1]} : vector<8x128xf32> to vector<8x32xf32>
    %175 = math.tanh %174 : vector<8x32xf32>
    %176 = vector.extract_strided_slice %167 {offsets = [0, 96], sizes = [8, 32], strides = [1, 1]} : vector<8x128xf32> to vector<8x32xf32>
    %177 = arith.negf %176 : vector<8x32xf32>
    %178 = math.exp %177 : vector<8x32xf32>
    %cst_48 = arith.constant 1.000000e+00 : f32
    %179 = vector.broadcast %cst_48 : f32 to vector<8x32xf32>
    %180 = arith.addf %179, %178 : vector<8x32xf32>
    %181 = arith.divf %179, %180 : vector<8x32xf32>
    %182 = arith.mulf %173, %175 : vector<8x32xf32>
    %183 = math.tanh %182 : vector<8x32xf32>
    %184 = arith.mulf %181, %183 : vector<8x32xf32>
    %185 = vector.extract_strided_slice %166 {offsets = [8, 0], sizes = [8, 128], strides = [1, 1]} : vector<16x128xf32> to vector<8x128xf32>
    %cst_49 = arith.constant dense<0.000000e+00> : vector<8x128xf32>
    %186 = tpu.matmul %184, %161, %cst_49 {dimension_numbers = #tpu.dot_dimension_numbers<[1], [0], [0], [1], [0, 0, 1, 1], [], []>} : vector<8x32xf32>, vector<32x128xf32>, vector<8x128xf32> -> vector<8x128xf32>
    %187 = arith.addf %185, %186 : vector<8x128xf32>
    %188 = vector.extract_strided_slice %187 {offsets = [0, 0], sizes = [8, 32], strides = [1, 1]} : vector<8x128xf32> to vector<8x32xf32>
    %189 = arith.negf %188 : vector<8x32xf32>
    %190 = math.exp %189 : vector<8x32xf32>
    %cst_50 = arith.constant 1.000000e+00 : f32
    %191 = vector.broadcast %cst_50 : f32 to vector<8x32xf32>
    %192 = arith.addf %191, %190 : vector<8x32xf32>
    %193 = arith.divf %191, %192 : vector<8x32xf32>
    %194 = vector.extract_strided_slice %187 {offsets = [0, 64], sizes = [8, 32], strides = [1, 1]} : vector<8x128xf32> to vector<8x32xf32>
    %195 = math.tanh %194 : vector<8x32xf32>
    %196 = vector.extract_strided_slice %187 {offsets = [0, 96], sizes = [8, 32], strides = [1, 1]} : vector<8x128xf32> to vector<8x32xf32>
    %197 = arith.negf %196 : vector<8x32xf32>
    %198 = math.exp %197 : vector<8x32xf32>
    %cst_51 = arith.constant 1.000000e+00 : f32
    %199 = vector.broadcast %cst_51 : f32 to vector<8x32xf32>
    %200 = arith.addf %199, %198 : vector<8x32xf32>
    %201 = arith.divf %199, %200 : vector<8x32xf32>
    %202 = vector.extract_strided_slice %187 {offsets = [0, 32], sizes = [8, 32], strides = [1, 1]} : vector<8x128xf32> to vector<8x32xf32>
    %203 = arith.negf %202 : vector<8x32xf32>
    %204 = math.exp %203 : vector<8x32xf32>
    %cst_52 = arith.constant 1.000000e+00 : f32
    %205 = vector.broadcast %cst_52 : f32 to vector<8x32xf32>
    %206 = arith.addf %205, %204 : vector<8x32xf32>
    %207 = arith.divf %205, %206 : vector<8x32xf32>
    %208 = arith.mulf %207, %182 : vector<8x32xf32>
    %209 = arith.mulf %193, %195 : vector<8x32xf32>
    %210 = arith.addf %208, %209 : vector<8x32xf32>
    %211 = math.tanh %210 : vector<8x32xf32>
    %212 = arith.mulf %201, %211 : vector<8x32xf32>
    %213 = tpu.concatenate %184, %212 in 0 : vector<8x32xf32>, vector<8x32xf32> -> vector<16x32xf32>
    %c0_53 = arith.constant 0 : index
    %c0_54 = arith.constant 0 : index
    %214 = vector.load %arg13[%c0_53, %c0_54] : memref<32x64xf32, #tpu.memory_space<vmem>>, vector<32x64xf32>
    %cst_55 = arith.constant dense<0.000000e+00> : vector<16x64xf32>
    %215 = tpu.matmul %213, %214, %cst_55 {dimension_numbers = #tpu.dot_dimension_numbers<[1], [0], [0], [1], [0, 0, 1, 1], [], []>} : vector<16x32xf32>, vector<32x64xf32>, vector<16x64xf32> -> vector<16x64xf32>
    %c0_56 = arith.constant 0 : index
    %c0_57 = arith.constant 0 : index
    %216 = vector.load %arg14[%c0_56, %c0_57] : memref<1x64xf32, #tpu.memory_space<vmem>>, vector<1x64xf32>
    %217 = vector.broadcast %216 : vector<1x64xf32> to vector<16x64xf32>
    %218 = arith.addf %215, %217 : vector<16x64xf32>
    %cst_58 = arith.constant 0.000000e+00 : f32
    %219 = vector.broadcast %cst_58 : f32 to vector<16x64xf32>
    %220 = arith.cmpf ogt, %218, %219 : vector<16x64xf32>
    %cst_59 = arith.constant 1.000000e-01 : f32
    %221 = vector.broadcast %cst_59 : f32 to vector<16x64xf32>
    %222 = arith.mulf %221, %218 : vector<16x64xf32>
    %223 = arith.select %220, %218, %222 : vector<16x64xi1>, vector<16x64xf32>
    %c0_60 = arith.constant 0 : index
    %c0_61 = arith.constant 0 : index
    %224 = vector.load %arg15[%c0_60, %c0_61] : memref<64x4xf32, #tpu.memory_space<vmem>>, vector<64x4xf32>
    %cst_62 = arith.constant dense<0.000000e+00> : vector<16x4xf32>
    %225 = tpu.matmul %223, %224, %cst_62 {dimension_numbers = #tpu.dot_dimension_numbers<[1], [0], [0], [1], [0, 0, 1, 1], [], []>} : vector<16x64xf32>, vector<64x4xf32>, vector<16x4xf32> -> vector<16x4xf32>
    %c0_63 = arith.constant 0 : index
    %c0_64 = arith.constant 0 : index
    %226 = vector.load %arg16[%c0_63, %c0_64] : memref<1x4xf32, #tpu.memory_space<vmem>>, vector<1x4xf32>
    %227 = vector.broadcast %226 : vector<1x4xf32> to vector<16x4xf32>
    %228 = arith.addf %225, %227 : vector<16x4xf32>
    %229 = math.tanh %228 : vector<16x4xf32>
    %230 = vector.shape_cast %229 : vector<16x4xf32> to vector<2x8x4xf32>
    %c0_65 = arith.constant 0 : index
    %c0_66 = arith.constant 0 : index
    %c0_67 = arith.constant 0 : index
    %231 = vector.load %arg17[%c0_65, %c0_66, %c0_67] : memref<1x8x4xf32, #tpu.memory_space<vmem>>, vector<1x8x4xf32>
    %232 = vector.broadcast %231 : vector<1x8x4xf32> to vector<2x8x4xf32>
    %233 = arith.mulf %230, %232 : vector<2x8x4xf32>
    %cst_68 = arith.constant dense<0.000000e+00> : vector<2x8xf32>
    %234 = vector.multi_reduction <add>, %233, %cst_68 [2] : vector<2x8x4xf32> to vector<2x8xf32>
    %cst_69 = arith.constant 1.000000e+00 : f32
    %235 = vector.broadcast %cst_69 : f32 to vector<1x8xf32>
    %cst_70 = arith.constant dense<0.000000e+00> : vector<1x2xf32>
    %236 = tpu.matmul %235, %234, %cst_70 {dimension_numbers = #tpu.dot_dimension_numbers<[1], [1], [0], [0], [0, 0, 1, 0], [], []>} : vector<1x8xf32>, vector<2x8xf32>, vector<1x2xf32> -> vector<1x2xf32>
    %c0_71 = arith.constant 0 : index
    %c0_72 = arith.constant 0 : index
    %237 = vector.load %arg18[%c0_71, %c0_72] : memref<1x1xf32, #tpu.memory_space<vmem>>, vector<1x1xf32>
    %238 = vector.extract %237[0, 0] : f32 from vector<1x1xf32>
    %239 = vector.broadcast %238 : f32 to vector<1x2xf32>
    %240 = arith.addf %236, %239 : vector<1x2xf32>
    %241 = arith.negf %240 : vector<1x2xf32>
    %242 = math.exp %241 : vector<1x2xf32>
    %cst_73 = arith.constant 1.000000e+00 : f32
    %243 = vector.broadcast %cst_73 : f32 to vector<1x2xf32>
    %244 = arith.addf %243, %242 : vector<1x2xf32>
    %245 = arith.divf %243, %244 : vector<1x2xf32>
    %c0_74 = arith.constant 0 : index
    %c0_75 = arith.constant 0 : index
    %246 = vector.load %arg19[%c0_74, %c0_75] : memref<1x2xf32, #tpu.memory_space<vmem>>, vector<1x2xf32>
    tpu.vector_store %arg19[%c0_74, %c0_75], %245 {strides = array<i32>} : memref<1x2xf32, #tpu.memory_space<vmem>>, vector<1x2xf32>,
    return
  }
}

</mosaic_0001>

<bundles_post_ra>
// kernel: discriminator_forward.1
= control target key start
LH: loop header
LB: loop body
LE: loop exit
PB: predicated region body
PF: predicated region fallthrough
CT: control target
= control target key end

     0   :  { %s2457_s0 = inlined_call_operand.vmem [shape: f32[2,8,4], index: 0, kind: input, shape index: {}]   ;;  %s2458_s1 = inlined_call_operand.hbm [shape: f32[4,128], index: 1, kind: input, shape index: {}]   ;;  %s2459_s2 = inlined_call_operand.vmem [shape: f32[32,128], index: 2, kind: input, shape index: {}]   ;;  %s2460_s3 = inlined_call_operand.hbm [shape: f32[1,128], index: 3, kind: input, shape index: {}]   ;;  %s2461_s4 = inlined_call_operand.vmem [shape: f32[32,128], index: 4, kind: input, shape index: {}]   ;;  %s2462_s5 = inlined_call_operand.vmem [shape: f32[32,128], index: 5, kind: input, shape index: {}]   ;;  %s2463_s6 = inlined_call_operand.hbm [shape: f32[1,128], index: 6, kind: input, shape index: {}]   ;;  %s2464_s7 = inlined_call_operand.vmem [shape: f32[32,128], index: 7, kind: input, shape index: {}]   ;;  %s2465_s8 = inlined_call_operand.hbm [shape: f32[32,128], index: 8, kind: input, shape index: {}]   ;;  %s2466_s9 = inlined_call_operand.hbm [shape: f32[1,128], index: 9, kind: input, shape index: {}]   ;;  %s2467_s10 = inlined_call_operand.hbm [shape: f32[32,128], index: 10, kind: input, shape index: {}]   ;;  %s2468_s11 = inlined_call_operand.hbm [shape: f32[32,128], index: 11, kind: input, shape index: {}]   ;;  %s2469_s12 = inlined_call_operand.hbm [shape: f32[1,128], index: 12, kind: input, shape index: {}]   ;;  %s2470_s13 = inlined_call_operand.vmem [shape: f32[32,64], index: 13, kind: input, shape index: {}]   ;;  %s2471_s14 = inlined_call_operand.hbm [shape: f32[1,64], index: 14, kind: input, shape index: {}]   ;;  %s2472_s15 = inlined_call_operand.vmem [shape: f32[64,4], index: 15, kind: input, shape index: {}]   ;;  %s2473_s16 = inlined_call_operand.hbm [shape: f32[1,4], index: 16, kind: input, shape index: {}]   ;;  %s2474_s17 = inlined_call_operand.vmem [shape: f32[1,8,4], index: 17, kind: input, shape index: {}]   ;;  %s2475_s18 = inlined_call_operand.<no memory space> [shape: f32[1,1], index: 18, kind: input, shape index: {}]   ;;  %s2476_s19 = inlined_call_operand.hbm [shape: f32[1,2], index: 19, kind: output, shape index: {}]  }
   0x1   :  { %2481 = sst [smem:[#allocation28_spill]] %s2457_s0  ;;  %v24_v0 = vstv %s2475_s18 }
   0x2   :  { %2482 = sst [smem:[#allocation29_spill]] %s2458_s1  ;;  %25 = vst [vmem:[#allocation2] sm:$0x1] %v24_v0 }
   0x3   :  { %2483 = sst [smem:[#allocation30_spill]] %s2459_s2 }
   0x4   :  { %2484 = sst [smem:[#allocation31_spill]] %s2460_s3 }
   0x5   :  { %26 = vsyncpa [#allocation4], 0 }
   0x6   :  { %27 = vsyncpa [#allocation7], 0 }
   0x7   :  { %28 = vsyncpa [#allocation10], 0 }
   0x8   :  { %29 = vsyncpa [#allocation13], 0 }
   0x9   :  { %30 = vsyncpa [#allocation16], 0 }
   0xa   :  { %31 = vsyncpa [#allocation19], 0 }
   0xb   :  { %32 = vsyncpa [#allocation5], 0  ;;  %s2019_s20 = smov [#allocation6]   ;;  %s2020_s1 = smov [#allocation9]  }
   0xc   :  { %s53_s21 = sshll.u32 %s2019_s20, 4  ;;  %s78_s22 = sshll.u32 %s2020_s1, 4  ;;  %s54_s21 = int_to_ptr.vmem [resolvable:$true] %s53_s21  ;;  %s2142_s22 = int_to_ptr.vmem [resolvable:$true] %s78_s22 }
   0xd   :  { %s2485_s24 = sld [smem:[#allocation31_spill]] }
  0x13   :  { %s1763_s25 = scalar_lea.hbm %s2485_s24, 16 }
  0x14   :  { %p1764_p0 = scmp.ne.s32.totalorder %s2485_s24, %s1763_s25  ;;  %p1767_p1 = scmp.lt.u32.totalorder %s1763_s25, %s2485_s24 }
  0x16   :  { %p1769_p2 = pnand %p1767_p1, %p1764_p0 }
  0x18   :  { %1772 = shalt.err (!%p1769_p2)
}
  0x19   :  { %s1773_s28 = scalar_lea.vmem %s54_s21, 16  ;;  %s1777_s29 = scalar_lea.vmem %s54_s21, 32 }
  0x1a   :  { %p1774_p3 = scmp.ne.s32.totalorder %s54_s21, %s1773_s28  ;;  %p1778_p4 = scmp.lt.s32.totalorder %s54_s21, %s54_s21 }
  0x1b   :  { %p1779_p5 = scmp.lt.s32.totalorder %s1777_s29, %s1773_s28 }
  0x1d   :  { %p1780_p6 = por %p1779_p5, %p1778_p4 }
  0x1f   :  { %p1781_p7 = pnand %p1780_p6, %p1774_p3 }
  0x21   :  { %1784 = shalt.err (!%p1781_p7)
}
  0x22   :  { %56 = dma.hbm_to_vmem [thread:$0]  %s2485_s24, 16, %s54_s21, [#allocation7]  }
  0x23   :  { %s1785_s2 = scalar_lea.hbm %s2465_s8, 512 }
  0x24   :  { %p1786_p8 = scmp.ne.s32.totalorder %s2465_s8, %s1785_s2  ;;  %p1789_p9 = scmp.lt.u32.totalorder %s1785_s2, %s2465_s8 }
  0x26   :  { %p1791_p10 = pnand %p1789_p9, %p1786_p8 }
  0x28   :  { %1794 = shalt.err (!%p1791_p10)
}
  0x29   :  { %s1795_s26 = scalar_lea.vmem %s2142_s22, 512  ;;  %p1800_p12 = scmp.lt.s32.totalorder %s2142_s22, %s2142_s22 }
  0x2a   :  { %p1796_p11 = scmp.ne.s32.totalorder %s2142_s22, %s1795_s26  ;;  %p1801_p13 = scmp.lt.s32.totalorder %s1795_s26, %s1795_s26 }
  0x2c   :  { %p1802_p0 = por %p1801_p13, %p1800_p12 }
  0x2e   :  { %p1803_p1 = pnand %p1802_p0, %p1796_p11 }
  0x30   :  { %1806 = shalt.err (!%p1803_p1)
}
  0x31   :  { %s2021_s21 = smov 128   ;;  %s2022_s24 = smov 8  }
  0x32   :  { %84 = dma.hbm_to_vmem [thread:$0]  %s2465_s8, 512, %s2142_s22, [#allocation10], %s2021_s21, %s2021_s21, %s2022_s24  }
  0x33   :  { %s2023_s29 = smov [#allocation12]   ;;  %s2024_s30 = smov [#allocation15]  }
  0x34   :  { %s100_s0 = sshll.u32 %s2023_s29, 4  ;;  %s125_s20 = sshll.u32 %s2024_s30, 4  ;;  %s101_s0 = int_to_ptr.vmem [resolvable:$true] %s100_s0  ;;  %s126_s20 = int_to_ptr.vmem [resolvable:$true] %s125_s20 }
  0x35   :  { %s1807_s23 = scalar_lea.hbm %s2467_s10, 512 }
  0x36   :  { %p1808_p2 = scmp.ne.s32.totalorder %s2467_s10, %s1807_s23  ;;  %p1811_p3 = scmp.lt.u32.totalorder %s1807_s23, %s2467_s10 }
  0x38   :  { %p1813_p4 = pnand %p1811_p3, %p1808_p2 }
  0x3a   :  { %1816 = shalt.err (!%p1813_p4)
}
  0x3b   :  { %s1817_s8 = scalar_lea.vmem %s101_s0, 512  ;;  %p1822_p6 = scmp.lt.s32.totalorder %s101_s0, %s101_s0 }
  0x3c   :  { %p1818_p5 = scmp.ne.s32.totalorder %s101_s0, %s1817_s8  ;;  %p1823_p7 = scmp.lt.s32.totalorder %s1817_s8, %s1817_s8 }
  0x3e   :  { %p1824_p8 = por %p1823_p7, %p1822_p6 }
  0x40   :  { %p1825_p9 = pnand %p1824_p8, %p1818_p5 }
  0x42   :  { %1828 = shalt.err (!%p1825_p9)
}
  0x43   :  { %106 = dma.hbm_to_vmem [thread:$0]  %s2467_s10, 512, %s101_s0, [#allocation13], %s2021_s21, %s2021_s21, %s2022_s24  }
  0x44   :  { %s1829_s30 = scalar_lea.hbm %s2469_s12, 16 }
  0x45   :  { %p1830_p10 = scmp.ne.s32.totalorder %s2469_s12, %s1829_s30  ;;  %p1833_p11 = scmp.lt.u32.totalorder %s1829_s30, %s2469_s12 }
  0x47   :  { %p1835_p12 = pnand %p1833_p11, %p1830_p10 }
  0x49   :  { %1838 = shalt.err (!%p1835_p12)
}
  0x4a   :  { %s1839_s18 = scalar_lea.vmem %s126_s20, 16  ;;  %s1843_s3 = scalar_lea.vmem %s126_s20, 32 }
  0x4b   :  { %p1840_p13 = scmp.ne.s32.totalorder %s126_s20, %s1839_s18  ;;  %p1844_p0 = scmp.lt.s32.totalorder %s126_s20, %s126_s20 }
  0x4c   :  { %p1845_p1 = scmp.lt.s32.totalorder %s1843_s3, %s1839_s18 }
  0x4e   :  { %p1846_p2 = por %p1845_p1, %p1844_p0 }
  0x50   :  { %p1847_p3 = pnand %p1846_p2, %p1840_p13 }
  0x52   :  { %1850 = shalt.err (!%p1847_p3)
}
  0x53   :  { %128 = dma.hbm_to_vmem [thread:$0]  %s2469_s12, 16, %s126_s20, [#allocation16]  }
  0x54   :  { %s2025_s26 = smov [#allocation3]   ;;  %s2026_s22 = smov [#allocation8]  }
  0x55   :  { %s41_s8 = sshll.u32 %s2025_s26, 4  ;;  %s67_s27 = sshll.u32 %s2026_s22, 4  ;;  %s42_s8 = int_to_ptr.vmem [resolvable:$true] %s41_s8  ;;  %s68_s27 = int_to_ptr.vmem [resolvable:$true] %s67_s27 }
  0x56   :  { %s2486_s30 = sld [smem:[#allocation29_spill]] }
  0x5c   :  { %s1851_s1 = scalar_lea.hbm %s2486_s30, 64 }
  0x5d   :  { %p1852_p4 = scmp.ne.s32.totalorder %s2486_s30, %s1851_s1  ;;  %p1855_p5 = scmp.lt.u32.totalorder %s1851_s1, %s2486_s30 }
  0x5f   :  { %p1857_p6 = pnand %p1855_p5, %p1852_p4 }
  0x61   :  { %1860 = shalt.err (!%p1857_p6)
}
  0x62   :  { %s1861_s12 = scalar_lea.vmem %s42_s8, 64  ;;  %p1866_p8 = scmp.lt.s32.totalorder %s42_s8, %s42_s8 }
  0x63   :  { %p1862_p7 = scmp.ne.s32.totalorder %s42_s8, %s1861_s12  ;;  %p1867_p9 = scmp.lt.s32.totalorder %s1861_s12, %s1861_s12 }
  0x65   :  { %p1868_p10 = por %p1867_p9, %p1866_p8 }
  0x67   :  { %p1869_p11 = pnand %p1868_p10, %p1862_p7 }
  0x69   :  { %1872 = shalt.err (!%p1869_p11)
}
  0x6a   :  { %44 = dma.hbm_to_vmem [thread:$0]  %s2486_s30, 64, %s42_s8, [#allocation4]  }
  0x6b   :  { %s1873_s26 = scalar_lea.hbm %s2463_s6, 16 }
  0x6c   :  { %p1874_p12 = scmp.ne.s32.totalorder %s2463_s6, %s1873_s26  ;;  %p1877_p13 = scmp.lt.u32.totalorder %s1873_s26, %s2463_s6 }
  0x6e   :  { %p1879_p0 = pnand %p1877_p13, %p1874_p12 }
  0x70   :  { %1882 = shalt.err (!%p1879_p0)
}
  0x71   :  { %s1883_s2 = scalar_lea.vmem %s68_s27, 16  ;;  %s1887_s23 = scalar_lea.vmem %s68_s27, 32 }
  0x72   :  { %p1884_p1 = scmp.ne.s32.totalorder %s68_s27, %s1883_s2  ;;  %p1888_p2 = scmp.lt.s32.totalorder %s68_s27, %s68_s27 }
  0x73   :  { %p1889_p3 = scmp.lt.s32.totalorder %s1887_s23, %s1883_s2 }
  0x75   :  { %p1890_p4 = por %p1889_p3, %p1888_p2 }
  0x77   :  { %p1891_p5 = pnand %p1890_p4, %p1884_p1 }
  0x79   :  { %1894 = shalt.err (!%p1891_p5)
}
  0x7a   :  { %70 = dma.hbm_to_vmem [thread:$0]  %s2463_s6, 16, %s68_s27, [#allocation7]  }
  0x7b   :  { %s2027_s25 = smov [#allocation11]   ;;  %s2028_s12 = smov [#allocation14]  }
  0x7c   :  { %s91_s18 = sshll.u32 %s2027_s25, 4  ;;  %s112_s20 = sshll.u32 %s2028_s12, 4  ;;  %s92_s18 = int_to_ptr.vmem [resolvable:$true] %s91_s18  ;;  %s2227_s20 = int_to_ptr.vmem [resolvable:$true] %s112_s20 }
  0x7d   :  { %s1895_s0 = scalar_lea.hbm %s2466_s9, 16 }
  0x7e   :  { %p1896_p6 = scmp.ne.s32.totalorder %s2466_s9, %s1895_s0  ;;  %p1899_p7 = scmp.lt.u32.totalorder %s1895_s0, %s2466_s9 }
  0x80   :  { %p1901_p8 = pnand %p1899_p7, %p1896_p6 }
  0x82   :  { %1904 = shalt.err (!%p1901_p8)
}
  0x83   :  { %s1905_s6 = scalar_lea.vmem %s92_s18, 16  ;;  %s1909_s27 = scalar_lea.vmem %s92_s18, 32 }
  0x84   :  { %p1906_p9 = scmp.ne.s32.totalorder %s92_s18, %s1905_s6  ;;  %p1910_p10 = scmp.lt.s32.totalorder %s92_s18, %s92_s18 }
  0x85   :  { %p1911_p11 = scmp.lt.s32.totalorder %s1909_s27, %s1905_s6 }
  0x87   :  { %p1912_p12 = por %p1911_p11, %p1910_p10 }
  0x89   :  { %p1913_p13 = pnand %p1912_p12, %p1906_p9 }
  0x8b   :  { %1916 = shalt.err (!%p1913_p13)
}
  0x8c   :  { %94 = dma.hbm_to_vmem [thread:$0]  %s2466_s9, 16, %s92_s18, [#allocation10]  }
  0x8d   :  { %s1917_s30 = scalar_lea.hbm %s2468_s11, 512 }
  0x8e   :  { %p1918_p0 = scmp.ne.s32.totalorder %s2468_s11, %s1917_s30  ;;  %p1921_p1 = scmp.lt.u32.totalorder %s1917_s30, %s2468_s11 }
  0x90   :  { %p1923_p2 = pnand %p1921_p1, %p1918_p0 }
  0x92   :  { %1926 = shalt.err (!%p1923_p2)
}
  0x93   :  { %s1927_s0 = scalar_lea.vmem %s2227_s20, 512  ;;  %p1932_p4 = scmp.lt.s32.totalorder %s2227_s20, %s2227_s20 }
  0x94   :  { %p1928_p3 = scmp.ne.s32.totalorder %s2227_s20, %s1927_s0  ;;  %p1933_p5 = scmp.lt.s32.totalorder %s1927_s0, %s1927_s0 }
  0x96   :  { %p1934_p6 = por %p1933_p5, %p1932_p4 }
  0x98   :  { %p1935_p7 = pnand %p1934_p6, %p1928_p3 }
  0x9a   :  { %1938 = shalt.err (!%p1935_p7)
}
  0x9b   :  { %118 = dma.hbm_to_vmem [thread:$0]  %s2468_s11, 512, %s2227_s20, [#allocation13], %s2021_s21, %s2021_s21, %s2022_s24  }
  0x9c   :  { %s2029_s26 = smov [#allocation17]   ;;  %s2030_s28 = smov [#allocation18]  }
  0x9d   :  { %s137_s22 = sshll.u32 %s2029_s26, 4  ;;  %s149_s29 = sshll.u32 %s2030_s28, 4  ;;  %s138_s22 = int_to_ptr.vmem [resolvable:$true] %s137_s22  ;;  %s150_s29 = int_to_ptr.vmem [resolvable:$true] %s149_s29 }
  0x9e   :  { %s1939_s1 = scalar_lea.hbm %s2471_s14, 16 }
  0x9f   :  { %p1940_p8 = scmp.ne.s32.totalorder %s2471_s14, %s1939_s1  ;;  %p1943_p9 = scmp.lt.u32.totalorder %s1939_s1, %s2471_s14 }
  0xa1   :  { %p1945_p10 = pnand %p1943_p9, %p1940_p8 }
  0xa3   :  { %1948 = shalt.err (!%p1945_p10)
}
  0xa4   :  { %s1949_s11 = scalar_lea.vmem %s138_s22, 16  ;;  %s1953_s21 = scalar_lea.vmem %s138_s22, 32 }
  0xa5   :  { %p1950_p11 = scmp.ne.s32.totalorder %s138_s22, %s1949_s11  ;;  %p1954_p12 = scmp.lt.s32.totalorder %s138_s22, %s138_s22 }
  0xa6   :  { %p1955_p13 = scmp.lt.s32.totalorder %s1953_s21, %s1949_s11 }
  0xa8   :  { %p1956_p0 = por %p1955_p13, %p1954_p12 }
  0xaa   :  { %p1957_p1 = pnand %p1956_p0, %p1950_p11 }
  0xac   :  { %1960 = shalt.err (!%p1957_p1)
}
  0xad   :  { %140 = dma.hbm_to_vmem [thread:$0]  %s2471_s14, 16, %s138_s22, [#allocation16]  }
  0xae   :  { %s1961_s3 = scalar_lea.hbm %s2473_s16, 16 }
  0xaf   :  { %p1962_p2 = scmp.ne.s32.totalorder %s2473_s16, %s1961_s3  ;;  %p1965_p3 = scmp.lt.u32.totalorder %s1961_s3, %s2473_s16 }
  0xb1   :  { %p1967_p4 = pnand %p1965_p3, %p1962_p2 }
  0xb3   :  { %1970 = shalt.err (!%p1967_p4)
}
  0xb4   :  { %s1971_s26 = scalar_lea.vmem %s150_s29, 16  ;;  %s1975_s28 = scalar_lea.vmem %s150_s29, 32 }
  0xb5   :  { %p1972_p5 = scmp.ne.s32.totalorder %s150_s29, %s1971_s26  ;;  %p1976_p6 = scmp.lt.s32.totalorder %s150_s29, %s150_s29 }
  0xb6   :  { %p1977_p7 = scmp.lt.s32.totalorder %s1975_s28, %s1971_s26 }
  0xb8   :  { %p1978_p8 = por %p1977_p7, %p1976_p6 }
  0xba   :  { %p1979_p9 = pnand %p1978_p8, %p1972_p5 }
  0xbc   :  { %1982 = shalt.err (!%p1979_p9)
}
  0xbd   :  { %152 = dma.hbm_to_vmem [thread:$0]  %s2473_s16, 16, %s150_s29, [#allocation19]  }
  0xbe   :  { %2005 = dma.done.wait [#allocation4], 64  }
  0xbf   :  { %2006 = vsyncadd [#allocation4], 4294967232 }
  0xc0   :  { %2007 = dma.done.wait [#allocation7], 32  }
  0xc1   :  { %2008 = vsyncadd [#allocation7], 4294967264 }
  0xc2   :  { %2009 = dma.done.wait [#allocation10], 528  }
  0xc3   :  { %2010 = vsyncadd [#allocation10], 4294966768 }
  0xc4   :  { %2011 = dma.done.wait [#allocation13], 1024  }
  0xc5   :  { %2012 = vsyncadd [#allocation13], 4294966272 }
  0xc6   :  { %2013 = dma.done.wait [#allocation16], 32  }
  0xc7   :  { %2014 = vsyncadd [#allocation16], 4294967264 }
  0xc8   :  { %2015 = dma.done.wait [#allocation19], 16  }
  0xc9   :  { %2016 = vsyncadd [#allocation19], 4294967280  ;;  %vm208_vm0 = vcmask 1043456   ;;  %vm201_vm1 = vcmask 31744   ;;  %v193_v1 = vld [vmem:[#allocation3] sm:$0xf] }
  0xca   :  { %s2487_s1 = sld [smem:[#allocation28_spill]]  ;;  %1480 = vmatprep.subr.msk.mxu1 %vm208_vm0, %v193_v1  ;;  %v1387_v4 = vld [vmem:[#allocation6] ss:$0 sm:$0xff]  ;;  %s2031_s2 = smov 64   ;;  %v2032_v19 = vmov 0.0|0.0   ;;  %vm2033_vm2 = vmmov 0  }
  0xcb   :  { %1481 = vmatpush3.msk.msra.mxu1 %vm208_vm0, %v193_v1  ;;  %s2488_s30 = sld [smem:[#allocation30_spill]]  ;;  %1597 = vmatprep.subr.bf16.mxu0 %v2032_v19  ;;  %v2034_v22 = vmov 0.0   ;;  %s2035_s3 = smov 96   ;;  %vm308_vm3 = vcmask 261120   ;;  %v414_v42 = vld [vmem:[%s2461_s4] sm:$0xff]  ;;  %v415_v43 = vld [vmem:[%s2461_s4 + $0x8] sm:$0xff] }
  0xcc   :  { %1493 = vmatprep.mubr.msk.f32.mxu0 %vm2033_vm2, %v2034_v22  ;;  %1611 = vmatprep.subr.bf16.mxu1 %v2032_v19  ;;  %s2036_s10 = smov 32   ;;  %v416_v44 = vld [vmem:[%s2461_s4 + $0x10] sm:$0xff]  ;;  %v1603_v45 = vpack.c.bf16 %v415_v43, %v414_v42  ;;  %v417_v46 = vld [vmem:[%s2461_s4 + $0x18] sm:$0xff]  ;;  %v1394_v52 = vld [vmem:[#allocation8] ss:$0 sm:$0xff]  ;;  %vm1173_vm6 = vcmask 523264  }
  0xcd   :  { %v1607_v47 = vpack.c.bf16 %v417_v46, %v416_v44  ;;  %v410_v0 = vld [vmem:[%s2462_s5] sm:$0xff]  ;;  %v411_v1 = vld [vmem:[%s2462_s5 + $0x8] sm:$0xff]  ;;  %vm1281_vm7 = vcmask 1041409   ;;  %vm1283_vm8 = vcmask 64512   ;;  %s2038_s25 = smov [#allocation20]   ;;  %vm1365_vm9 = vcmask 8192  }
  0xce   :  { %s1373_s12 = sshll.u32 %s2038_s25, 4  ;;  %s1374_s12 = int_to_ptr.vmem [resolvable:$true] %s1373_s12 }
  0xcf   :  { %s1983_s0 = scalar_lea.vmem %s1374_s12, 16  ;;  %p1988_p11 = scmp.lt.s32.totalorder %s1374_s12, %s1374_s12 }
  0xd0   :  { %v187_v2 = vld [vmem:[%s2487_s1] sm:$0xff]  ;;  %v188_v3 = vld [vmem:[%s2487_s1 + $0x8] sm:$0xff]  ;;  %p1984_p10 = scmp.ne.s32.totalorder %s1374_s12, %s1983_s0 }
  0xd1   :  { %1482 = vmatprep.mubr.msk.f32.mxu1 %vm201_vm1, %v187_v2  ;;  %v189_v16 = vld [vmem:[%s2488_s30] sm:$0xff]  ;;  %v190_v17 = vld [vmem:[%s2488_s30 + $0x8] sm:$0xff]  ;;  %v191_v18 = vld [vmem:[%s2488_s30 + $0x10] sm:$0xff] }
  0xd2   :  { %1483 = vmatmul.mubr.msk.f32.vlgmr.msra.gmra.mrb[0].mxu1 %vm201_vm1, %v188_v3  ;;  %v1598_v20 = vpack.c.bf16 %v190_v17, %v189_v16  ;;  %v192_v21 = vld [vmem:[%s2488_s30 + $0x18] sm:$0xff]  ;;  %v412_v2 = vld [vmem:[%s2462_s5 + $0x10] sm:$0xff]  ;;  %v1612_v3 = vpack.c.bf16 %v411_v1, %v410_v0 }
  0xd3   :  { %1515 = vmatprep.mubr.msk.f32.mxu1 %vm2033_vm2, %v2034_v22  ;;  %v1601_v23 = vpack.c.bf16 %v192_v21, %v191_v18 }
  0xd4   :  { %1599 = vmatpush3.bf16.msra.mxu0 %v1598_v20  ;;  %1613 = vmatpush3.bf16.msra.mxu1 %v1612_v3 }
  0xd5   :  { %1600 = vmatprep.subr.bf16.mxu0 %v2032_v19  ;;  %1614 = vmatprep.subr.bf16.mxu1 %v2032_v19 }
  0xd8   :  { %1602 = vmatpush3.bf16.msra.mxu0 %v1601_v23 }
  0xd9   :  { %1604 = vmatprep.subr.bf16.mxu0 %v1603_v45 }
 0x1a5   :  { %v1484_v5 = vpop.f32.mrb[0].mxu1 }
 0x1a6   :  { %v284_v6 = vadd.f32 %v1484_v5, %v1387_v4  ;;  %v278_v7 = vpop.f32.mrb[1].mxu1 }
 0x1a7   :  { %v279_v8 = vadd.f32 %v1387_v4, %v278_v7  ;;  %v413_v4 = vld [vmem:[%s2462_s5 + $0x18] sm:$0xff] }
 0x1a8   :  { %v1615_v5 = vpack.c.bf16 %v413_v4, %v412_v2 }
 0x1a9   :  { %1691 = vtanh.f32 %v279_v8  ;;  %v1391_v10 = vmul.f32 -1.442695, %v279_v8 }
 0x1aa   :  { %1616 = vmatpush3.bf16.msra.mxu1 %v1615_v5 }
 0x1ab   :  { %1693 = vpow2.f32 %v1391_v10  ;;  %1625 = vmatprep.subr.bf16.mxu1 %v2032_v19 }
 0x1b3   :  { %v1692_v9 = vpop.eup %1691 }
 0x1b4   :  { %295 = vrot.lane.b32.xlu0 %v1692_v9, %s2031_s2 }
 0x1b5   :  { %v1694_v11 = vpop.eup %1693 }
 0x1b6   :  { %v290_v12 = vadd.f32 1.0, %v1694_v11 }
 0x1b8   :  { %1695 = vrcp.f32 %v290_v12 }
 0x1c2   :  { %v1696_v13 = vpop.eup %1695 }
 0x226   :  { %v296_v14 = vpop.permute.xlu0 %295 }
 0x227   :  { %v298_v15 = vmul.f32 %v1696_v13, %v296_v14 }
 0x229   :  { %1697 = vtanh.f32 %v298_v15 }
 0x233   :  { %v1698_v24 = vpop.eup %1697 }
 0x234   :  { %301 = vrot.lane.b32.xlu0 %v1698_v24, %s2035_s3 }
 0x238   :  { %390 = vrot.lane.b32.xlu0 %v298_v15, %s2036_s10 }
 0x2a6   :  { %v302_v25 = vpop.permute.xlu0 %301 }
 0x2a7   :  { %v304_v26 = vmul.f32 %v1696_v13, %v302_v25 }
 0x2a9   :  { %306 = vrot.lane.b32.xlu1 %v304_v26, %s2036_s10  ;;  %v631_v26 = vld [vmem:[%s2464_s7] sm:$0xff] }
 0x2aa   :  { %v391_v38 = vpop.permute.xlu0 %390 }
 0x31b   :  { %v307_v27 = vpop.permute.xlu1 %306 }
 0x31c   :  { %1494 = vmatmul.mubr.msk.f32.vlgmr.msra.gmra.mrb[0].mxu0 %vm308_vm3, %v307_v27 }
 0x31d   :  { %1504 = vmatprep.mubr.msk.f32.mxu0 %vm308_vm3, %v307_v27  ;;  %1606 = vmatpush3.bf16.msra.mxu0 %v1603_v45  ;;  %v632_v27 = vld [vmem:[%s2464_s7 + $0x8] sm:$0xff] }
 0x31e   :  { %1608 = vmatprep.subr.bf16.mxu0 %v1607_v47 }
 0x321   :  { %1610 = vmatpush3.bf16.msra.mxu0 %v1607_v47 }
 0x3ef   :  { %v377_v28 = vpop.f32.mrb[0].mxu0 }
 0x3f0   :  { %v381_v29 = vadd.f32 %v377_v28, %v284_v6  ;;  %v1495_v30 = vpop.f32.mrb[1].mxu0  ;;  %v633_v28 = vld [vmem:[%s2464_s7 + $0x10] sm:$0xff] }
 0x3f1   :  { %v634_v30 = vld [vmem:[%s2464_s7 + $0x18] sm:$0xff]  ;;  %s1987_s7 = scalar_lea.vmem %s1374_s12, 32 }
 0x3f2   :  { %1699 = vtanh.f32 %v381_v29  ;;  %v1393_v32 = vmul.f32 -1.442695, %v381_v29  ;;  %v1617_v29 = vpack.c.bf16 %v632_v27, %v631_v26  ;;  %p1989_p12 = scmp.lt.s32.totalorder %s1987_s7, %s1983_s0 }
 0x3f4   :  { %1701 = vpow2.f32 %v1393_v32  ;;  %1618 = vmatprep.subr.bf16.mxu0 %v1617_v29  ;;  %p1990_p13 = por %p1989_p12, %p1988_p11 }
 0x3f6   :  { %p1991_p0 = pnand %p1990_p13, %p1984_p10 }
 0x3fc   :  { %v1700_v31 = vpop.eup %1699 }
 0x3fd   :  { %395 = vrot.lane.b32.xlu1 %v1700_v31, %s2031_s2  ;;  %v1621_v31 = vpack.c.bf16 %v634_v30, %v633_v28 }
 0x3fe   :  { %v1702_v33 = vpop.eup %1701 }
 0x3ff   :  { %v385_v34 = vadd.f32 1.0, %v1702_v33 }
 0x401   :  { %1703 = vrcp.f32 %v385_v34 }
 0x40b   :  { %v1704_v35 = vpop.eup %1703 }
 0x40c   :  { %v393_v39 = vmul.f32 %v1704_v35, %v391_v38 }
 0x46f   :  { %v396_v36 = vpop.permute.xlu1 %395 }
 0x470   :  { %v398_v37 = vmul.f32 %v1704_v35, %v396_v36  ;;  %v1400_v36 = vld [vmem:[#allocation11] ss:$0 sm:$0xff] }
 0x472   :  { %400 = vrot.lane.b32.xlu1 %v398_v37, %s2036_s10 }
 0x4e4   :  { %v401_v40 = vpop.permute.xlu1 %400 }
 0x4e5   :  { %v403_v41 = vadd.f32 %v401_v40, %v393_v39 }
 0x4e7   :  { %1705 = vtanh.f32 %v403_v41 }
 0x4f1   :  { %v1706_v48 = vpop.eup %1705 }
 0x4f2   :  { %406 = vrot.lane.b32.xlu0 %v1706_v48, %s2031_s2  ;;  %v627_v48 = vld [vmem:[#allocation9] sm:$0xff] }
 0x564   :  { %v407_v49 = vpop.permute.xlu0 %406 }
 0x565   :  { %v409_v50 = vmul.f32 %v1704_v35, %v407_v49  ;;  %v628_v49 = vld [vmem:[#allocation9 + $0x8] sm:$0xff] }
 0x567   :  { %426 = vrot.lane.b32.xlu1 %v409_v50, %s2036_s10  ;;  %v629_v50 = vld [vmem:[#allocation9 + $0x10] sm:$0xff] }
 0x5d9   :  { %v427_v51 = vpop.permute.xlu1 %426 }
 0x5da   :  { %1505 = vmatmul.mubr.msk.f32.vlgmr.msra.gmra.mrb[2].mxu0 %vm308_vm3, %v427_v51  ;;  %v1626_v51 = vpack.c.bf16 %v628_v49, %v627_v48 }
 0x5db   :  { %1620 = vmatpush3.bf16.msra.mxu0 %v1617_v29 }
 0x5dc   :  { %1622 = vmatprep.subr.bf16.mxu0 %v1621_v31 }
 0x5df   :  { %1624 = vmatpush3.bf16.msra.mxu0 %v1621_v31 }
 0x6ad   :  { %v1506_v53 = vpop.f32.mrb[2].mxu0 }
 0x6ae   :  { %v502_v54 = vadd.f32 %v1506_v53, %v1394_v52  ;;  %v496_v55 = vpop.f32.mrb[3].mxu0 }
 0x6af   :  { %v497_v56 = vadd.f32 %v1394_v52, %v496_v55  ;;  %v630_v52 = vld [vmem:[#allocation9 + $0x18] sm:$0xff] }
 0x6b0   :  { %v1629_v53 = vpack.c.bf16 %v630_v52, %v629_v50 }
 0x6b1   :  { %1707 = vtanh.f32 %v497_v56  ;;  %v1397_v58 = vmul.f32 -1.442695, %v497_v56 }
 0x6b3   :  { %1709 = vpow2.f32 %v1397_v58 }
 0x6bb   :  { %v1708_v57 = vpop.eup %1707 }
 0x6bc   :  { %513 = vrot.lane.b32.xlu0 %v1708_v57, %s2031_s2 }
 0x6bd   :  { %v1710_v59 = vpop.eup %1709 }
 0x6be   :  { %v508_v60 = vadd.f32 1.0, %v1710_v59 }
 0x6c0   :  { %1711 = vrcp.f32 %v508_v60 }
 0x6ca   :  { %v1712_v61 = vpop.eup %1711 }
 0x72e   :  { %v514_v62 = vpop.permute.xlu0 %513 }
 0x72f   :  { %v516_v63 = vmul.f32 %v1712_v61, %v514_v62 }
 0x731   :  { %1713 = vtanh.f32 %v516_v63 }
 0x73b   :  { %v1714_v6 = vpop.eup %1713 }
 0x73c   :  { %519 = vrot.lane.b32.xlu1 %v1714_v6, %s2035_s3 }
 0x7ae   :  { %v520_v7 = vpop.permute.xlu1 %519 }
 0x7af   :  { %v522_v8 = vmul.f32 %v1712_v61, %v520_v7 }
 0x7b1   :  { %524 = vrot.lane.b32.xlu0 %v522_v8, %s2036_s10  ;;  %v848_v8 = vld [vmem:[#allocation12] sm:$0xff] }
 0x7b5   :  { %607 = vrot.lane.b32.xlu0 %v516_v63, %s2036_s10 }
 0x823   :  { %v525_v9 = vpop.permute.xlu0 %524 }
 0x824   :  { %1516 = vmatmul.mubr.msk.f32.vlgmr.msra.gmra.mrb[2].mxu1 %vm308_vm3, %v525_v9  ;;  %1526 = vmatprep.mubr.msk.f32.mxu0 %vm308_vm3, %v525_v9  ;;  %v849_v9 = vld [vmem:[#allocation12 + $0x8] sm:$0xff] }
 0x825   :  { %1537 = vmatprep.mubr.msk.f32.mxu1 %vm2033_vm2, %v2034_v22  ;;  %1627 = vmatpush3.bf16.msra.mxu1 %v1626_v51 }
 0x826   :  { %1628 = vmatprep.subr.bf16.mxu1 %v2032_v19 }
 0x827   :  { %v608_v21 = vpop.permute.xlu0 %607 }
 0x829   :  { %1630 = vmatpush3.bf16.msra.mxu1 %v1629_v53 }
 0x82a   :  { %1639 = vmatprep.subr.bf16.mxu1 %v2032_v19 }
 0x8f7   :  { %v594_v10 = vpop.f32.mrb[2].mxu1 }
 0x8f8   :  { %v598_v11 = vadd.f32 %v594_v10, %v502_v54  ;;  %v1517_v12 = vpop.f32.mrb[3].mxu1  ;;  %v850_v10 = vld [vmem:[#allocation12 + $0x10] sm:$0xff] }
 0x8f9   :  { %v851_v12 = vld [vmem:[#allocation12 + $0x18] sm:$0xff] }
 0x8fa   :  { %1715 = vtanh.f32 %v598_v11  ;;  %v1399_v14 = vmul.f32 -1.442695, %v598_v11  ;;  %v1631_v11 = vpack.c.bf16 %v849_v9, %v848_v8  ;;  %v1163_v8 = vld [vmem:[%s2472_s15 + $0x28] sm:$0xff] }
 0x8fc   :  { %1717 = vpow2.f32 %v1399_v14  ;;  %1632 = vmatprep.subr.bf16.mxu0 %v1631_v11 }
 0x904   :  { %v1716_v13 = vpop.eup %1715 }
 0x905   :  { %612 = vrot.lane.b32.xlu1 %v1716_v13, %s2031_s2  ;;  %v1635_v13 = vpack.c.bf16 %v851_v12, %v850_v10  ;;  %v1164_v10 = vld [vmem:[%s2472_s15 + $0x30] sm:$0xff]  ;;  %v1412_v12 = vld [vmem:[#allocation17] ss:$0 sm:$0xff] }
 0x906   :  { %v1718_v15 = vpop.eup %1717 }
 0x907   :  { %v602_v16 = vadd.f32 1.0, %v1718_v15 }
 0x909   :  { %1719 = vrcp.f32 %v602_v16 }
 0x913   :  { %v1720_v17 = vpop.eup %1719 }
 0x914   :  { %v610_v23 = vmul.f32 %v1720_v17, %v608_v21 }
 0x977   :  { %v613_v18 = vpop.permute.xlu1 %612 }
 0x978   :  { %v615_v20 = vmul.f32 %v1720_v17, %v613_v18  ;;  %v1406_v18 = vld [vmem:[#allocation15] ss:$0 sm:$0xff] }
 0x97a   :  { %617 = vrot.lane.b32.xlu1 %v615_v20, %s2036_s10 }
 0x9ec   :  { %v618_v24 = vpop.permute.xlu1 %617 }
 0x9ed   :  { %v620_v25 = vadd.f32 %v618_v24, %v610_v23 }
 0x9ef   :  { %1721 = vtanh.f32 %v620_v25 }
 0x9f9   :  { %v1722_v32 = vpop.eup %1721 }
 0x9fa   :  { %623 = vrot.lane.b32.xlu0 %v1722_v32, %s2031_s2  ;;  %v844_v32 = vld [vmem:[#allocation14] sm:$0xff] }
 0xa6c   :  { %v624_v33 = vpop.permute.xlu0 %623 }
 0xa6d   :  { %v626_v34 = vmul.f32 %v1720_v17, %v624_v33  ;;  %v845_v33 = vld [vmem:[#allocation14 + $0x8] sm:$0xff] }
 0xa6f   :  { %643 = vrot.lane.b32.xlu1 %v626_v34, %s2036_s10  ;;  %v846_v34 = vld [vmem:[#allocation14 + $0x10] sm:$0xff] }
 0xae1   :  { %v644_v35 = vpop.permute.xlu1 %643 }
 0xae2   :  { %1527 = vmatmul.mubr.msk.f32.vlgmr.msra.gmra.mrb[4].mxu0 %vm308_vm3, %v644_v35  ;;  %v1640_v35 = vpack.c.bf16 %v845_v33, %v844_v32 }
 0xae3   :  { %1634 = vmatpush3.bf16.msra.mxu0 %v1631_v11  ;;  %v1165_v11 = vld [vmem:[%s2472_s15 + $0x38] sm:$0xff] }
 0xae4   :  { %1636 = vmatprep.subr.bf16.mxu0 %v1635_v13 }
 0xae7   :  { %1638 = vmatpush3.bf16.msra.mxu0 %v1635_v13 }
 0xbb5   :  { %v1528_v37 = vpop.f32.mrb[4].mxu0 }
 0xbb6   :  { %v719_v38 = vadd.f32 %v1528_v37, %v1400_v36  ;;  %v713_v39 = vpop.f32.mrb[5].mxu0 }
 0xbb7   :  { %v714_v40 = vadd.f32 %v1400_v36, %v713_v39  ;;  %v847_v36 = vld [vmem:[#allocation14 + $0x18] sm:$0xff] }
 0xbb8   :  { %v1643_v37 = vpack.c.bf16 %v847_v36, %v846_v34  ;;  %v1271_v36 = vlaneseq }
 0xbb9   :  { %1723 = vtanh.f32 %v714_v40  ;;  %v1403_v42 = vmul.f32 -1.442695, %v714_v40 }
 0xbbb   :  { %1725 = vpow2.f32 %v1403_v42 }
 0xbc3   :  { %v1724_v41 = vpop.eup %1723 }
 0xbc4   :  { %730 = vrot.lane.b32.xlu0 %v1724_v41, %s2031_s2 }
 0xbc5   :  { %v1726_v43 = vpop.eup %1725 }
 0xbc6   :  { %v725_v44 = vadd.f32 1.0, %v1726_v43 }
 0xbc8   :  { %1727 = vrcp.f32 %v725_v44 }
 0xbd2   :  { %v1728_v45 = vpop.eup %1727 }
 0xc36   :  { %v731_v46 = vpop.permute.xlu0 %730 }
 0xc37   :  { %v733_v47 = vmul.f32 %v1728_v45, %v731_v46 }
 0xc39   :  { %1729 = vtanh.f32 %v733_v47 }
 0xc43   :  { %v1730_v54 = vpop.eup %1729 }
 0xc44   :  { %736 = vrot.lane.b32.xlu1 %v1730_v54, %s2035_s3 }
 0xcb6   :  { %v737_v55 = vpop.permute.xlu1 %736 }
 0xcb7   :  { %v739_v56 = vmul.f32 %v1728_v45, %v737_v55  ;;  %v1061_v55 = vld [vmem:[%s2470_s13] sm:$0xff] }
 0xcb9   :  { %741 = vrot.lane.b32.xlu0 %v739_v56, %s2036_s10  ;;  %v1062_v56 = vld [vmem:[%s2470_s13 + $0x8] sm:$0xff] }
 0xcbd   :  { %824 = vrot.lane.b32.xlu0 %v733_v47, %s2036_s10 }
 0xd2b   :  { %v742_v57 = vpop.permute.xlu0 %741 }
 0xd2c   :  { %1538 = vmatmul.mubr.msk.f32.vlgmr.msra.gmra.mrb[4].mxu1 %vm308_vm3, %v742_v57  ;;  %1548 = vmatprep.mubr.msk.f32.mxu0 %vm308_vm3, %v742_v57  ;;  %v1063_v57 = vld [vmem:[%s2470_s13 + $0x10] sm:$0xff] }
 0xd2d   :  { %1559 = vmatprep.mubr.msk.f32.mxu1 %vm2033_vm2, %v2034_v22  ;;  %1641 = vmatpush3.bf16.msra.mxu1 %v1640_v35  ;;  %v1266_v35 = vld [vmem:[#allocation2] sm:$0x1] }
 0xd2e   :  { %1642 = vmatprep.subr.bf16.mxu1 %v2032_v19  ;;  %1669 = vpush %v1266_v35 }
 0xd2f   :  { %v825_v4 = vpop.permute.xlu0 %824 }
 0xd31   :  { %1644 = vmatpush3.bf16.msra.mxu1 %v1643_v37  ;;  %v1272_v37 = vand.u32 127, %v1271_v36 }
 0xdff   :  { %v811_v58 = vpop.f32.mrb[4].mxu1 }
 0xe00   :  { %v815_v59 = vadd.f32 %v811_v58, %v719_v38  ;;  %v1539_v60 = vpop.f32.mrb[5].mxu1  ;;  %v1645_v58 = vpack.c.bf16 %v1062_v56, %v1061_v55 }
 0xe02   :  { %1731 = vtanh.f32 %v815_v59  ;;  %v1405_v62 = vmul.f32 -1.442695, %v815_v59  ;;  %v1064_v59 = vld [vmem:[%s2470_s13 + $0x18] sm:$0xff]  ;;  %1646 = vmatprep.subr.bf16.mxu0 %v1645_v58 }
 0xe03   :  { %v1649_v60 = vpack.c.bf16 %v1064_v59, %v1063_v57 }
 0xe04   :  { %1733 = vpow2.f32 %v1405_v62  ;;  %v1158_v62 = vld [vmem:[%s2472_s15] sm:$0xff] }
 0xe0c   :  { %v1732_v61 = vpop.eup %1731 }
 0xe0d   :  { %829 = vrot.lane.b32.xlu1 %v1732_v61, %s2031_s2 }
 0xe0e   :  { %v1734_v63 = vpop.eup %1733 }
 0xe0f   :  { %v819_v0 = vadd.f32 1.0, %v1734_v63  ;;  %v1159_v63 = vld [vmem:[%s2472_s15 + $0x8] sm:$0xff] }
 0xe11   :  { %1735 = vrcp.f32 %v819_v0  ;;  %v1160_v0 = vld [vmem:[%s2472_s15 + $0x10] sm:$0xff] }
 0xe1b   :  { %v1736_v1 = vpop.eup %1735 }
 0xe1c   :  { %v827_v5 = vmul.f32 %v1736_v1, %v825_v4 }
 0xe7f   :  { %v830_v2 = vpop.permute.xlu1 %829 }
 0xe80   :  { %v832_v3 = vmul.f32 %v1736_v1, %v830_v2  ;;  %v1161_v2 = vld [vmem:[%s2472_s15 + $0x18] sm:$0xff] }
 0xe82   :  { %834 = vrot.lane.b32.xlu1 %v832_v3, %s2036_s10  ;;  %v1657_v3 = vpack.c.bf16 %v1161_v2, %v1160_v0 }
 0xef4   :  { %v835_v6 = vpop.permute.xlu1 %834 }
 0xef5   :  { %v837_v7 = vadd.f32 %v835_v6, %v827_v5 }
 0xef7   :  { %1737 = vtanh.f32 %v837_v7  ;;  %v1162_v7 = vld [vmem:[%s2472_s15 + $0x20] sm:$0xff] }
 0xef8   :  { %v1661_v9 = vpack.c.bf16 %v1163_v8, %v1162_v7 }
 0xf01   :  { %v1738_v14 = vpop.eup %1737 }
 0xf02   :  { %840 = vrot.lane.b32.xlu0 %v1738_v14, %s2031_s2 }
 0xf74   :  { %v841_v15 = vpop.permute.xlu0 %840 }
 0xf75   :  { %v843_v16 = vmul.f32 %v1736_v1, %v841_v15  ;;  %v1653_v1 = vpack.c.bf16 %v1159_v63, %v1158_v62 }
 0xf77   :  { %860 = vrot.lane.b32.xlu1 %v843_v16, %s2036_s10  ;;  %1654 = vmatprep.subr.bf16.mxu1 %v1653_v1 }
 0xfe9   :  { %v861_v17 = vpop.permute.xlu1 %860 }
 0xfea   :  { %1549 = vmatmul.mubr.msk.f32.vlgmr.msra.gmra.mrb[6].mxu0 %vm308_vm3, %v861_v17 }
 0xfeb   :  { %1648 = vmatpush3.bf16.msra.mxu0 %v1645_v58 }
 0xfec   :  { %1650 = vmatprep.subr.bf16.mxu0 %v1649_v60 }
 0xfef   :  { %1652 = vmatpush3.bf16.msra.mxu0 %v1649_v60 }
 0xff0   :  { %1592 = vmatprep.subr.mxu0 %v2034_v22 }
0x10bd   :  { %v1550_v20 = vpop.f32.mrb[6].mxu0 }
0x10be   :  { %v936_v21 = vadd.f32 %v1550_v20, %v1406_v18  ;;  %v930_v23 = vpop.f32.mrb[7].mxu0 }
0x10bf   :  { %v931_v24 = vadd.f32 %v1406_v18, %v930_v23  ;;  %v1415_v23 = vld [vmem:[#allocation18] ss:$0 sm:$0xff] }
0x10c1   :  { %1739 = vtanh.f32 %v931_v24  ;;  %v1409_v26 = vmul.f32 -1.442695, %v931_v24 }
0x10c3   :  { %1741 = vpow2.f32 %v1409_v26 }
0x10cb   :  { %v1740_v25 = vpop.eup %1739 }
0x10cc   :  { %947 = vrot.lane.b32.xlu0 %v1740_v25, %s2031_s2 }
0x10cd   :  { %v1742_v27 = vpop.eup %1741 }
0x10ce   :  { %v942_v28 = vadd.f32 1.0, %v1742_v27 }
0x10d0   :  { %1743 = vrcp.f32 %v942_v28  ;;  %v1257_v28 = vld [vmem:[%s2474_s17] sm:$0xff]  ;;  %s1670_s17 = spop %1669 }
0x10da   :  { %v1744_v29 = vpop.eup %1743 }
0x113e   :  { %v948_v30 = vpop.permute.xlu0 %947 }
0x113f   :  { %v950_v31 = vmul.f32 %v1744_v29, %v948_v30 }
0x1141   :  { %1745 = vtanh.f32 %v950_v31 }
0x114b   :  { %v1746_v38 = vpop.eup %1745 }
0x114c   :  { %953 = vrot.lane.b32.xlu1 %v1746_v38, %s2035_s3  ;;  %v1274_v38 = vshrl.u32 %v1271_v36, 7 }
0x11be   :  { %v954_v39 = vpop.permute.xlu1 %953 }
0x11bf   :  { %v956_v40 = vmul.f32 %v1744_v29, %v954_v39  ;;  %v1275_v39 = vsub.s32 %v1272_v37, %v1274_v38 }
0x11c1   :  { %958 = vrot.lane.b32.xlu0 %v956_v40, %s2036_s10 }
0x11c5   :  { %1041 = vrot.lane.b32.xlu0 %v950_v31, %s2036_s10 }
0x1233   :  { %v959_v41 = vpop.permute.xlu0 %958 }
0x1234   :  { %1560 = vmatmul.mubr.msk.f32.vlgmr.msra.gmra.mrb[6].mxu1 %vm308_vm3, %v959_v41  ;;  %1570 = vmatprep.mubr.msk.f32.mxu0 %vm308_vm3, %v959_v41 }
0x1235   :  { %1656 = vmatpush3.bf16.msra.mxu1 %v1653_v1 }
0x1236   :  { %1658 = vmatprep.subr.bf16.mxu1 %v1657_v3 }
0x1237   :  { %v1042_v51 = vpop.permute.xlu0 %1041 }
0x1239   :  { %1660 = vmatpush3.bf16.msra.mxu1 %v1657_v3 }
0x123a   :  { %1662 = vmatprep.subr.bf16.mxu1 %v1661_v9 }
0x123d   :  { %1664 = vmatpush3.bf16.msra.mxu1 %v1661_v9 }
0x1307   :  { %v1028_v42 = vpop.f32.mrb[6].mxu1 }
0x1308   :  { %v1032_v43 = vadd.f32 %v1028_v42, %v936_v21  ;;  %v1561_v44 = vpop.f32.mrb[7].mxu1 }
0x130a   :  { %1747 = vtanh.f32 %v1032_v43  ;;  %v1411_v45 = vmul.f32 -1.442695, %v1032_v43 }
0x130c   :  { %1749 = vpow2.f32 %v1411_v45  ;;  %v1268_v45 = vstv %s1670_s17 }
0x1314   :  { %v1748_v19 = vpop.eup %1747 }
0x1315   :  { %1046 = vrot.lane.b32.xlu1 %v1748_v19, %s2031_s2  ;;  %v2037_v19 = vmov 1.0  }
0x1316   :  { %v1750_v46 = vpop.eup %1749 }
0x1317   :  { %v1036_v47 = vadd.f32 1.0, %v1750_v46 }
0x1319   :  { %1751 = vrcp.f32 %v1036_v47 }
0x1323   :  { %v1752_v48 = vpop.eup %1751 }
0x1324   :  { %v1044_v52 = vmul.f32 %v1752_v48, %v1042_v51 }
0x1387   :  { %v1047_v49 = vpop.permute.xlu1 %1046 }
0x1388   :  { %v1049_v50 = vmul.f32 %v1752_v48, %v1047_v49 }
0x138a   :  { %1051 = vrot.lane.b32.xlu1 %v1049_v50, %s2036_s10 }
0x13fc   :  { %v1052_v53 = vpop.permute.xlu1 %1051 }
0x13fd   :  { %v1054_v54 = vadd.f32 %v1052_v53, %v1044_v52 }
0x13ff   :  { %1753 = vtanh.f32 %v1054_v54 }
0x1409   :  { %v1754_v61 = vpop.eup %1753 }
0x140a   :  { %1057 = vrot.lane.b32.xlu0 %v1754_v61, %s2031_s2 }
0x147c   :  { %v1058_v4 = vpop.permute.xlu0 %1057 }
0x147d   :  { %v1060_v5 = vmul.f32 %v1752_v48, %v1058_v4 }
0x147f   :  { %1073 = vrot.lane.b32.xlu1 %v1060_v5, %s2036_s10 }
0x14f1   :  { %v1074_v6 = vpop.permute.xlu1 %1073 }
0x14f2   :  { %1571 = vmatmul.mubr.msk.f32.vlgmr.msra.gmra.mrb[8].mxu0 %vm308_vm3, %v1074_v6 }
0x14f3   :  { %1594 = vmatprep.mubr.msk.f32.mxu0 %vm2033_vm2, %v2034_v22  ;;  %v1665_v22 = vpack.c.bf16 %v1165_v11, %v1164_v10 }
0x14f5   :  { %1666 = vmatprep.subr.bf16.mxu1 %v1665_v22 }
0x14f6   :  { %1668 = vmatpush3.bf16.msra.mxu1 %v1665_v22 }
0x15c5   :  { %v1572_v13 = vpop.f32.mrb[8].mxu0 }
0x15c6   :  { %v1149_v14 = vadd.f32 %v1572_v13, %v1412_v12  ;;  %v1143_v15 = vpop.f32.mrb[9].mxu0 }
0x15c7   :  { %v1144_v16 = vadd.f32 %v1412_v12, %v1143_v15 }
0x15c8   :  { %v1155_v17 = vmul.f32 0.1, %v1149_v14  ;;  %vm1153_vm4 = vcmp.gt.f32.partialorder %v1149_v14, 0.0 }
0x15c9   :  { %vm1152_vm5 = vcmp.gt.f32.partialorder %v1144_v16, 0.0  ;;  %v1154_v18 = vmul.f32 0.1, %v1144_v16 }
0x15ca   :  { %v1157_v21 = vsel %vm1153_vm4, %v1149_v14, %v1155_v17 }
0x15cb   :  { %v1156_v20 = vsel %vm1152_vm5, %v1144_v16, %v1154_v18 }
0x15cc   :  { %1589 = vmatprep.mubr.msk.f32.mxu1 %vm1173_vm6, %v1156_v20 }
0x15cd   :  { %1590 = vmatmul.mubr.msk.f32.vlgmr.msra.gmra.mrb[8].mxu1 %vm1173_vm6, %v1157_v21 }
0x16a0   :  { %v1591_v24 = vpop.f32.mrb[8].mxu1 }
0x16a1   :  { %v1252_v25 = vadd.f32 %v1591_v24, %v1415_v23  ;;  %v1246_v26 = vpop.f32.mrb[9].mxu1 }
0x16a2   :  { %v1247_v27 = vadd.f32 %v1415_v23, %v1246_v26 }
0x16a3   :  { %1755 = vtanh.f32 %v1252_v25 }
0x16a4   :  { %1757 = vtanh.f32 %v1247_v27 }
0x16ad   :  { %v1756_v29 = vpop.eup %1755 }
0x16ae   :  { %v1758_v30 = vpop.eup %1757  ;;  %v1259_v31 = vmul.f32 %v1756_v29, %v1257_v28 }
0x16af   :  { %v1258_v32 = vmul.f32 %v1758_v30, %v1257_v28 }
0x16b0   :  { %v1263_v33 = vsel %vm201_vm1, %v1259_v31, 0.0 }
0x16b1   :  { %1264 = vadd.xlane.f32.xlu1 %v1263_v33  ;;  %v1260_v34 = vsel %vm201_vm1, %v1258_v32, 0.0 }
0x16b2   :  { %1261 = vadd.xlane.f32.xlu0 %v1260_v34 }
0x173e   :  { %v1265_v40 = vpop.xlane.xlu1 %1264 }
0x173f   :  { %v1280_v41 = vrot.slane %v1265_v40, %v1275_v39  ;;  %v1262_v42 = vpop.xlane.xlu0 %1261 }
0x1740   :  { %v1276_v43 = vrot.slane %v1262_v42, %v1275_v39 }
0x1742   :  { %v1282_v44 = vsel %vm1281_vm7, %v1280_v41, %v1276_v43 }
0x1743   :  { %1593 = vmatpush3.xpose.msk.msra.mxu0 %vm1283_vm8, %v1282_v44 }
0x1746   :  { %1595 = vmatmul.mubr.msk.f32.vlgmr.msra.gmra.mrb[10].mxu0 %vm1283_vm8, %v2037_v19 }
0x1819   :  { %v1355_v46 = vpop.f32.mrb[10].mxu0 }
0x181a   :  { %v1356_v47 = vadd.f32 %v1355_v46, %v1268_v45  ;;  %v1596_v48 = vpop.f32.mrb[11].mxu0 }
0x181c   :  { %v1420_v49 = vmul.f32 -1.442695, %v1356_v47 }
0x181e   :  { %1759 = vpow2.f32 %v1420_v49 }
0x1828   :  { %v1760_v50 = vpop.eup %1759 }
0x1829   :  { %v1362_v51 = vadd.f32 1.0, %v1760_v50 }
0x182b   :  { %1761 = vrcp.f32 %v1362_v51 }
0x1835   :  { %v1762_v52 = vpop.eup %1761 }
0x1836   :  { %1366 = vst.msk [vmem:[#allocation20] sm:$0x1] %vm1365_vm9, %v1762_v52 }
0x1837   :  { %1994 = shalt.err (!%p1991_p0)
}
0x1838   :  { %s1995_s18 = scalar_lea.hbm %s2476_s19, 16 }
0x1839   :  { %p1996_p1 = scmp.ne.s32.totalorder %s2476_s19, %s1995_s18  ;;  %p1999_p2 = scmp.lt.u32.totalorder %s1995_s18, %s2476_s19 }
0x183b   :  { %p2001_p3 = pnand %p1999_p2, %p1996_p1 }
0x183d   :  { %2004 = shalt.err (!%p2001_p3)
}
0x183e   :  { %1376 = dma.vmem_to_hbm [thread:$0]  %s1374_s12, 16, %s2476_s19, [#allocation5]  }
0x183f   :  { %2017 = dma.done.wait [#allocation5], 16  }
0x1840   :  { %2018 = vsyncadd [#allocation5], 4294967280 }
0x1841   :  { %1380 = vsyncpa [#allocation4], 1 }
0x1842   :  { %1381 = vsyncpa [#allocation7], 1 }
0x1843   :  { %1382 = vsyncpa [#allocation10], 1 }
0x1844   :  { %1383 = vsyncpa [#allocation13], 1 }
0x1845   :  { %1384 = vsyncpa [#allocation16], 1 }
0x1846   :  { %1385 = vsyncpa [#allocation19], 1 }
0x1847   :  { %1386 = vsyncpa [#allocation5], 1 }

</bundles_post_ra>
